<compile_context>
chip_gen: v5e
topology: v5e:2x2
jax: 0.10.0
libtpu: 0.0.40
codegen_flags: <defaults>
</compile_context>

<pallas_src>
import functools
import math

import jax
import jax.numpy as jnp
from jax.experimental import pallas as pl
from jax.experimental.pallas import tpu as pltpu


# ---------------------------------------------------------------------------
# Rotary cos/sin tables (RotaryPositionalEmbedding equivalent, f32)
# ---------------------------------------------------------------------------
def rotary_cos_sin(seq_len, dim, base=10000.0):
    inv_freq = 1.0 / (base ** (jnp.arange(0, dim, 2, dtype=jnp.float32) / dim))
    t = jnp.arange(seq_len, dtype=jnp.float32)
    freqs = jnp.outer(t, inv_freq)                       # (T, D/2)
    emb = jnp.concatenate([freqs, freqs], axis=-1)       # (T, D)
    return jnp.cos(emb), jnp.sin(emb)                    # each (T, D)


def _fold_rotate_half_into_weight(w, num_heads, head_dim):
    """Return R^T @ w, where rotate_half(x) == x @ R^T (per-head signed swap).

    Per head (D consecutive rows of w): new rows = [ w[2nd half], -w[1st half] ].
    Lets the kernel compute rotate_half(x) @ w as x @ (R^T w): no in-kernel
    lane slicing / rolling / concatenation for the rotary step.
    """
    C = w.shape[0]
    w3 = w.reshape(num_heads, head_dim, C)
    w1 = w3[:, : head_dim // 2, :]
    w2 = w3[:, head_dim // 2:, :]
    return jnp.concatenate([w2, -w1], axis=1).reshape(C, C)


# ---------------------------------------------------------------------------
# Fused kernel: rotary (weight-folded) + QKV projections + attention + out proj
# Per grid step: one (T, Bblk, C) slab of the batch axis; rows flattened to
# M = T*Bblk (t-major, b-minor) for every matmul.
# ---------------------------------------------------------------------------
def _rotary_mha_kernel(q_ref, k_ref, v_ref, cos_ref, sin_ref,
                       wq_ref, wqr_ref, bq_ref,
                       wk_ref, wkr_ref, bk_ref,
                       wv_ref, bv_ref,
                       wo_ref, bo_ref,
                       o_ref, ctx_sc, *, num_heads, head_dim):
    H, D = num_heads, head_dim
    T, Bblk, C = q_ref.shape
    M = T * Bblk
    f32 = jnp.float32
    mdt = wq_ref.dtype                     # MXU-input dtype (bf16), f32 accum

    cos = cos_ref[...]                     # (M, C) f32, row m = t*Bblk+b -> cos[t]
    sin = sin_ref[...]

    q = q_ref[...].reshape(M, C).astype(f32)   # rotary elementwise math in f32
    k = k_ref[...].reshape(M, C).astype(f32)
    v = v_ref[...].reshape(M, C)               # bf16, straight into the MXU

    # Rotary folded into the projections (wrapper pre-permuted wq_r / wk_r):
    #   q_rot @ Wq == (q*cos) @ Wq + (q*sin) @ (R^T Wq)
    qc = (q * cos).astype(mdt)
    qs = (q * sin).astype(mdt)
    kc = (k * cos).astype(mdt)
    ks = (k * sin).astype(mdt)

    q_p = (jnp.dot(qc, wq_ref[...], preferred_element_type=f32)
           + jnp.dot(qs, wqr_ref[...], preferred_element_type=f32)
           + bq_ref[...])                      # 1/sqrt(d_k) already folded in
    k_p = (jnp.dot(kc, wk_ref[...], preferred_element_type=f32)
           + jnp.dot(ks, wkr_ref[...], preferred_element_type=f32)
           + bk_ref[...])
    v_p = jnp.dot(v, wv_ref[...], preferred_element_type=f32) + bv_ref[...]

    q_p = q_p.astype(mdt)
    k_p = k_p.astype(mdt)
    v_p = v_p.astype(mdt)

    # All folded batch elements share one (M, M) score matmul per head; a
    # block-diagonal mask (batch id = m % Bblk) keeps attention within each
    # batch element, so no row re-shuffling / transposes are needed in-kernel.
    if Bblk > 1:
        rb = jax.lax.broadcasted_iota(jnp.int32, (M, M), 0)
        cb = jax.lax.broadcasted_iota(jnp.int32, (M, M), 1)
        same_batch = (rb % Bblk) == (cb % Bblk)
    neg_big = jnp.float32(-1e30)

    # TODO(synk): key_padding_mask path not implemented (mask=None case only);
    # attention dropout is identity in eval mode.
    for h in range(H):                         # static unroll; each head's
        cols = slice(h * D, (h + 1) * D)       # temporaries die at the store
        qh = q_p[:, cols]                      # (M, D)
        kh = k_p[:, cols]
        vh = v_p[:, cols]
        s = jax.lax.dot_general(qh, kh, (((1,), (1,)), ((), ())),
                                preferred_element_type=f32)        # (M, M)
        if Bblk > 1:
            s = jnp.where(same_batch, s, neg_big)
        s = s - jnp.max(s, axis=-1, keepdims=True)
        e = jnp.exp(s)                                             # f32 softmax
        p = e * pl.reciprocal(jnp.sum(e, axis=-1, keepdims=True), approx=True)
        ctx_sc[:, cols] = jnp.dot(p.astype(mdt), vh,
                                  preferred_element_type=f32)      # (M, D)

    out = (jnp.dot(ctx_sc[...].astype(mdt), wo_ref[...],
                   preferred_element_type=f32) + bo_ref[...])      # (M, C)
    o_ref[...] = out.reshape(T, Bblk, C)


# ---------------------------------------------------------------------------
# Wrapper
# ---------------------------------------------------------------------------
def _pick_batch_fold(B, T):
    """How many batch elements to fold per grid step (raises the matmul M dim).

    Small problems take the whole batch; otherwise use a multiple-of-8 divisor
    of B so the (second-minor) block dim stays tiling-legal.
    """
    if B * T <= 2048:
        return B
    for cand in (64, 32, 16, 8):
        if B % cand == 0:
            return cand
    return B


@functools.partial(jax.jit, static_argnames=("num_heads",))
def rotary_mha_forward(query, key, value, params, *, num_heads):
    """query/key/value: (T, B, C) float32 -> (out (T, B, C) float32, None)."""
    T, B, C = query.shape
    H = num_heads
    assert C % H == 0, "n_feat must be divisible by n_head"
    D = C // H
    assert D % 2 == 0, "head_dim must be even for rotate_half"

    Bblk = _pick_batch_fold(B, T)
    assert B % Bblk == 0
    M = Bblk * T
    mdt = jnp.bfloat16                     # MXU-input dtype (f32 accumulation)

    # Rotary tables, tiled across heads and repeated across the folded batch
    # (row m = t*Bblk + b -> cos[t]); kept f32 for the elementwise math.
    cos, sin = rotary_cos_sin(T, D)                               # (T, D)
    cos_m = jnp.repeat(jnp.tile(cos, (1, H)), Bblk, axis=0)       # (M, C)
    sin_m = jnp.repeat(jnp.tile(sin, (1, H)), Bblk, axis=0)

    # Fold 1/sqrt(d_k) into the q projection and rotate_half into pre-permuted
    # weight copies; biases stay f32 (added after f32 accumulation).
    scale = 1.0 / math.sqrt(D)
    wq = params["wq"] * scale
    bq = (params["bq"] * scale).astype(jnp.float32)
    wq_r = _fold_rotate_half_into_weight(wq, H, D)
    wk = params["wk"]
    wk_r = _fold_rotate_half_into_weight(wk, H, D)

    wq, wq_r, wk, wk_r = (w.astype(mdt) for w in (wq, wq_r, wk, wk_r))
    wv = params["wv"].astype(mdt)
    wo = params["wo"].astype(mdt)
    bk = params["bk"].astype(jnp.float32)
    bv = params["bv"].astype(jnp.float32)
    bo = params["bo"].astype(jnp.float32)

    # Inputs stay in the module's native (T, B, C) layout — no boundary
    # transposes; each grid step takes a (T, Bblk, C) slab of the batch axis.
    q_in = query.astype(mdt)
    k_in = key.astype(mdt)
    v_in = value.astype(mdt)

    x_spec = pl.BlockSpec((T, Bblk, C), lambda b: (0, b, 0))
    tab_spec = pl.BlockSpec((M, C), lambda b: (0, 0))
    w_spec = pl.BlockSpec((C, C), lambda b: (0, 0))
    b_spec = pl.BlockSpec((1, C), lambda b: (0, 0))

    # Scoped-VMEM limit from the per-step footprint (never below the default
    # scoped limits, never above v7x's 64 MiB physical VMEM).
    blk = T * Bblk * C
    est = (3 * 2 + 4) * blk * 2                      # q/k/v bf16 + out f32, x2 buffers
    est += 2 * M * C * 4 * 2                         # cos / sin
    est += (6 * C * C * 2 + 4 * C * 4) * 2           # weights (bf16) + biases (f32)
    est += 6 * M * C * 4 + 2 * H * M * M * 4         # scratch + live temporaries
    vmem_limit = int(min(max(32 * 2 ** 20, 2 * est), 64 * 2 ** 20))

    out = pl.pallas_call(
        functools.partial(_rotary_mha_kernel, num_heads=H, head_dim=D),
        grid=(B // Bblk,),
        in_specs=[x_spec, x_spec, x_spec, tab_spec, tab_spec,
                  w_spec, w_spec, b_spec,          # q proj (+ rotate-half copy)
                  w_spec, w_spec, b_spec,          # k proj (+ rotate-half copy)
                  w_spec, b_spec,                  # v proj
                  w_spec, b_spec],                 # out proj
        out_specs=x_spec,
        out_shape=jax.ShapeDtypeStruct((T, B, C), jnp.float32),
        scratch_shapes=[pltpu.VMEM((M, C), jnp.float32)],
        compiler_params=pltpu.CompilerParams(
            dimension_semantics=("parallel",),
            vmem_limit_bytes=vmem_limit),
    )(q_in, k_in, v_in, cos_m, sin_m,
      wq, wq_r, bq, wk, wk_r, bk, wv, bv, wo, bo)

    return out, None                               # matches reference return


# ---------------------------------------------------------------------------
# Pure-JAX f32 reference (mirrors the PyTorch forward) for a correctness check
# ---------------------------------------------------------------------------
def reference_forward(query, key, value, params, num_heads):
    T, B, C = query.shape
    H = num_heads
    D = C // H
    cos, sin = rotary_cos_sin(T, D)
    cos4 = cos[:, None, None, :]
    sin4 = sin[:, None, None, :]

    def rh(x):
        return jnp.concatenate([-x[..., D // 2:], x[..., :D // 2]], axis=-1)

    q4 = query.reshape(T, B, H, D)
    k4 = key.reshape(T, B, H, D)
    q4 = q4 * cos4 + rh(q4) * sin4
    k4 = k4 * cos4 + rh(k4) * sin4

    q = q4.reshape(T, B, C).transpose(1, 0, 2)     # (B, T, C)
    k = k4.reshape(T, B, C).transpose(1, 0, 2)
    v = value.transpose(1, 0, 2)

    qp = q @ params["wq"] + params["bq"]
    kp = k @ params["wk"] + params["bk"]
    vp = v @ params["wv"] + params["bv"]

    def split(x):                                  # (B,T,C) -> (B,H,T,D)
        return x.reshape(B, T, H, D).transpose(0, 2, 1, 3)

    qh, kh, vh = split(qp), split(kp), split(vp)
    s = jnp.einsum("bhtd,bhsd->bhts", qh, kh) / math.sqrt(D)
    p = jax.nn.softmax(s, axis=-1)
    ctx = jnp.einsum("bhts,bhsd->bhtd", p, vh)
    ctx = ctx.transpose(0, 2, 1, 3).reshape(B, T, C)
    out = ctx @ params["wo"] + params["bo"]
    return out.transpose(1, 0, 2)                  # (T, B, C)


# ---------------------------------------------------------------------------
# Deterministic synthetic parameters
# ---------------------------------------------------------------------------
def init_params(key, C):
    ks = jax.random.split(key, 8)
    nrm = lambda k, shape: 0.1 * jax.random.normal(k, shape, jnp.float32)
    return dict(wq=nrm(ks[0], (C, C)), bq=nrm(ks[1], (1, C)),
                wk=nrm(ks[2], (C, C)), bk=nrm(ks[3], (1, C)),
                wv=nrm(ks[4], (C, C)), bv=nrm(ks[5], (1, C)),
                wo=nrm(ks[6], (C, C)), bo=nrm(ks[7], (1, C)))


if __name__ == "__main__":
    # n_feat=32, n_head=4 (d_k=8), T=8, B=2
    T, B, C, H = 8, 2, 32, 4
    root = jax.random.PRNGKey(0)
    kp, kq, kk, kv = jax.random.split(root, 4)
    params = init_params(kp, C)
    query = jax.random.normal(kq, (T, B, C), jnp.float32)
    key_t = jax.random.normal(kk, (T, B, C), jnp.float32)
    value = jax.random.normal(kv, (T, B, C), jnp.float32)

    out, attn = rotary_mha_forward(query, key_t, value, params, num_heads=H)
    out = jax.block_until_ready(out)

    assert out.shape == (T, B, C) and attn is None
    assert bool(jnp.all(jnp.isfinite(out)))

    ref = reference_forward(query, key_t, value, params, H)
    # bf16 MXU inputs (f32 accumulation) + approx softmax reciprocal: compare
    # against the pure-f32 reference with a bf16-appropriate tolerance.
    max_err = float(jnp.max(jnp.abs(out - ref)))
    assert bool(jnp.allclose(out, ref, rtol=5e-2, atol=5e-2)), max_err
    print("KERNEL_OK")
</pallas_src>

<mosaic_0001>
module attributes {stable_mosaic.version = 11 : i64} {
  func.func @_rotary_mha_kernel(%arg0: i32, %arg1: memref<8x2x32xbf16, #tpu.memory_space<vmem>>, %arg2: memref<8x2x32xbf16, #tpu.memory_space<vmem>>, %arg3: memref<8x2x32xbf16, #tpu.memory_space<vmem>>, %arg4: memref<16x32xf32, #tpu.memory_space<vmem>>, %arg5: memref<16x32xf32, #tpu.memory_space<vmem>>, %arg6: memref<32x32xbf16, #tpu.memory_space<vmem>>, %arg7: memref<32x32xbf16, #tpu.memory_space<vmem>>, %arg8: memref<1x32xf32, #tpu.memory_space<vmem>>, %arg9: memref<32x32xbf16, #tpu.memory_space<vmem>>, %arg10: memref<32x32xbf16, #tpu.memory_space<vmem>>, %arg11: memref<1x32xf32, #tpu.memory_space<vmem>>, %arg12: memref<32x32xbf16, #tpu.memory_space<vmem>>, %arg13: memref<1x32xf32, #tpu.memory_space<vmem>>, %arg14: memref<32x32xbf16, #tpu.memory_space<vmem>>, %arg15: memref<1x32xf32, #tpu.memory_space<vmem>>, %arg16: memref<8x2x32xf32, #tpu.memory_space<vmem>>, %arg17: memref<16x32xf32, #tpu.memory_space<vmem>>) attributes {dimension_semantics = [#tpu.dimension_semantics<parallel>], iteration_bounds = array<i64: 1>, scalar_prefetch = 0 : i64, scratch_operands = 1 : i64, tpu.core_type = #tpu.core_type<tc>, window_params = [{transform_indices = @transform_0, window_bounds = array<i64: 8, 2, 32>}, {transform_indices = @transform_1, window_bounds = array<i64: 8, 2, 32>}, {transform_indices = @transform_2, window_bounds = array<i64: 8, 2, 32>}, {pipeline_mode = #tpu.pipeline_mode<synchronous>, transform_indices = @transform_3, window_bounds = array<i64: 16, 32>}, {pipeline_mode = #tpu.pipeline_mode<synchronous>, transform_indices = @transform_4, window_bounds = array<i64: 16, 32>}, {pipeline_mode = #tpu.pipeline_mode<synchronous>, transform_indices = @transform_5, window_bounds = array<i64: 32, 32>}, {pipeline_mode = #tpu.pipeline_mode<synchronous>, transform_indices = @transform_6, window_bounds = array<i64: 32, 32>}, {pipeline_mode = #tpu.pipeline_mode<synchronous>, transform_indices = @transform_7, window_bounds = array<i64: 1, 32>}, {pipeline_mode = #tpu.pipeline_mode<synchronous>, transform_indices = @transform_8, window_bounds = array<i64: 32, 32>}, {pipeline_mode = #tpu.pipeline_mode<synchronous>, transform_indices = @transform_9, window_bounds = array<i64: 32, 32>}, {pipeline_mode = #tpu.pipeline_mode<synchronous>, transform_indices = @transform_10, window_bounds = array<i64: 1, 32>}, {pipeline_mode = #tpu.pipeline_mode<synchronous>, transform_indices = @transform_11, window_bounds = array<i64: 32, 32>}, {pipeline_mode = #tpu.pipeline_mode<synchronous>, transform_indices = @transform_12, window_bounds = array<i64: 1, 32>}, {pipeline_mode = #tpu.pipeline_mode<synchronous>, transform_indices = @transform_13, window_bounds = array<i64: 32, 32>}, {pipeline_mode = #tpu.pipeline_mode<synchronous>, transform_indices = @transform_14, window_bounds = array<i64: 1, 32>}, {transform_indices = @transform_15, window_bounds = array<i64: 8, 2, 32>}]} {
    %c0 = arith.constant 0 : index
    %c0_0 = arith.constant 0 : index
    %0 = vector.load %arg4[%c0, %c0_0] : memref<16x32xf32, #tpu.memory_space<vmem>>, vector<16x32xf32>
    %c0_1 = arith.constant 0 : index
    %c0_2 = arith.constant 0 : index
    %1 = vector.load %arg5[%c0_1, %c0_2] : memref<16x32xf32, #tpu.memory_space<vmem>>, vector<16x32xf32>
    %c0_3 = arith.constant 0 : index
    %c0_4 = arith.constant 0 : index
    %c0_5 = arith.constant 0 : index
    %2 = vector.load %arg1[%c0_3, %c0_4, %c0_5] : memref<8x2x32xbf16, #tpu.memory_space<vmem>>, vector<8x2x32xbf16>
    %3 = vector.shape_cast %2 : vector<8x2x32xbf16> to vector<16x32xbf16>
    %4 = arith.extf %3 : vector<16x32xbf16> to vector<16x32xf32>
    %c0_6 = arith.constant 0 : index
    %c0_7 = arith.constant 0 : index
    %c0_8 = arith.constant 0 : index
    %5 = vector.load %arg2[%c0_6, %c0_7, %c0_8] : memref<8x2x32xbf16, #tpu.memory_space<vmem>>, vector<8x2x32xbf16>
    %6 = vector.shape_cast %5 : vector<8x2x32xbf16> to vector<16x32xbf16>
    %7 = arith.extf %6 : vector<16x32xbf16> to vector<16x32xf32>
    %c0_9 = arith.constant 0 : index
    %c0_10 = arith.constant 0 : index
    %c0_11 = arith.constant 0 : index
    %8 = vector.load %arg3[%c0_9, %c0_10, %c0_11] : memref<8x2x32xbf16, #tpu.memory_space<vmem>>, vector<8x2x32xbf16>
    %9 = vector.shape_cast %8 : vector<8x2x32xbf16> to vector<16x32xbf16>
    %10 = arith.mulf %4, %0 : vector<16x32xf32>
    %11 = arith.truncf %10 : vector<16x32xf32> to vector<16x32xbf16>
    %12 = arith.mulf %4, %1 : vector<16x32xf32>
    %13 = arith.truncf %12 : vector<16x32xf32> to vector<16x32xbf16>
    %14 = arith.mulf %7, %0 : vector<16x32xf32>
    %15 = arith.truncf %14 : vector<16x32xf32> to vector<16x32xbf16>
    %16 = arith.mulf %7, %1 : vector<16x32xf32>
    %17 = arith.truncf %16 : vector<16x32xf32> to vector<16x32xbf16>
    %c0_12 = arith.constant 0 : index
    %c0_13 = arith.constant 0 : index
    %18 = vector.load %arg6[%c0_12, %c0_13] : memref<32x32xbf16, #tpu.memory_space<vmem>>, vector<32x32xbf16>
    %cst = arith.constant dense<0.000000e+00> : vector<16x32xf32>
    %19 = tpu.matmul %11, %18, %cst {dimension_numbers = #tpu.dot_dimension_numbers<[1], [0], [0], [1], [0, 0, 1, 1], [], []>} : vector<16x32xbf16>, vector<32x32xbf16>, vector<16x32xf32> -> vector<16x32xf32>
    %c0_14 = arith.constant 0 : index
    %c0_15 = arith.constant 0 : index
    %20 = vector.load %arg7[%c0_14, %c0_15] : memref<32x32xbf16, #tpu.memory_space<vmem>>, vector<32x32xbf16>
    %cst_16 = arith.constant dense<0.000000e+00> : vector<16x32xf32>
    %21 = tpu.matmul %13, %20, %cst_16 {dimension_numbers = #tpu.dot_dimension_numbers<[1], [0], [0], [1], [0, 0, 1, 1], [], []>} : vector<16x32xbf16>, vector<32x32xbf16>, vector<16x32xf32> -> vector<16x32xf32>
    %22 = arith.addf %19, %21 : vector<16x32xf32>
    %c0_17 = arith.constant 0 : index
    %c0_18 = arith.constant 0 : index
    %23 = vector.load %arg8[%c0_17, %c0_18] : memref<1x32xf32, #tpu.memory_space<vmem>>, vector<1x32xf32>
    %24 = vector.broadcast %23 : vector<1x32xf32> to vector<16x32xf32>
    %25 = arith.addf %22, %24 : vector<16x32xf32>
    %c0_19 = arith.constant 0 : index
    %c0_20 = arith.constant 0 : index
    %26 = vector.load %arg9[%c0_19, %c0_20] : memref<32x32xbf16, #tpu.memory_space<vmem>>, vector<32x32xbf16>
    %cst_21 = arith.constant dense<0.000000e+00> : vector<16x32xf32>
    %27 = tpu.matmul %15, %26, %cst_21 {dimension_numbers = #tpu.dot_dimension_numbers<[1], [0], [0], [1], [0, 0, 1, 1], [], []>} : vector<16x32xbf16>, vector<32x32xbf16>, vector<16x32xf32> -> vector<16x32xf32>
    %c0_22 = arith.constant 0 : index
    %c0_23 = arith.constant 0 : index
    %28 = vector.load %arg10[%c0_22, %c0_23] : memref<32x32xbf16, #tpu.memory_space<vmem>>, vector<32x32xbf16>
    %cst_24 = arith.constant dense<0.000000e+00> : vector<16x32xf32>
    %29 = tpu.matmul %17, %28, %cst_24 {dimension_numbers = #tpu.dot_dimension_numbers<[1], [0], [0], [1], [0, 0, 1, 1], [], []>} : vector<16x32xbf16>, vector<32x32xbf16>, vector<16x32xf32> -> vector<16x32xf32>
    %30 = arith.addf %27, %29 : vector<16x32xf32>
    %c0_25 = arith.constant 0 : index
    %c0_26 = arith.constant 0 : index
    %31 = vector.load %arg11[%c0_25, %c0_26] : memref<1x32xf32, #tpu.memory_space<vmem>>, vector<1x32xf32>
    %32 = vector.broadcast %31 : vector<1x32xf32> to vector<16x32xf32>
    %33 = arith.addf %30, %32 : vector<16x32xf32>
    %c0_27 = arith.constant 0 : index
    %c0_28 = arith.constant 0 : index
    %34 = vector.load %arg12[%c0_27, %c0_28] : memref<32x32xbf16, #tpu.memory_space<vmem>>, vector<32x32xbf16>
    %cst_29 = arith.constant dense<0.000000e+00> : vector<16x32xf32>
    %35 = tpu.matmul %9, %34, %cst_29 {dimension_numbers = #tpu.dot_dimension_numbers<[1], [0], [0], [1], [0, 0, 1, 1], [], []>} : vector<16x32xbf16>, vector<32x32xbf16>, vector<16x32xf32> -> vector<16x32xf32>
    %c0_30 = arith.constant 0 : index
    %c0_31 = arith.constant 0 : index
    %36 = vector.load %arg13[%c0_30, %c0_31] : memref<1x32xf32, #tpu.memory_space<vmem>>, vector<1x32xf32>
    %37 = vector.broadcast %36 : vector<1x32xf32> to vector<16x32xf32>
    %38 = arith.addf %35, %37 : vector<16x32xf32>
    %39 = arith.truncf %25 : vector<16x32xf32> to vector<16x32xbf16>
    %40 = arith.truncf %33 : vector<16x32xf32> to vector<16x32xbf16>
    %41 = arith.truncf %38 : vector<16x32xf32> to vector<16x32xbf16>
    %42 = tpu.iota {dimensions = array<i32: 0>} : vector<16x16xi32>
    %43 = tpu.iota {dimensions = array<i32: 1>} : vector<16x16xi32>
    %c2_i32 = arith.constant 2 : i32
    %c0_i32 = arith.constant 0 : i32
    %44 = arith.cmpi eq, %c2_i32, %c0_i32 : i32
    %c1_i32 = arith.constant 1 : i32
    %45 = arith.select %44, %c1_i32, %c2_i32 : i32
    %46 = vector.broadcast %45 : i32 to vector<16x16xi32>
    %47 = arith.remsi %42, %46 : vector<16x16xi32>
    %c0_i32_32 = arith.constant 0 : i32
    %48 = vector.broadcast %c0_i32_32 : i32 to vector<16x16xi32>
    %49 = arith.cmpi ne, %47, %48 : vector<16x16xi32>
    %c0_i32_33 = arith.constant 0 : i32
    %50 = vector.broadcast %c0_i32_33 : i32 to vector<16x16xi32>
    %51 = arith.cmpi slt, %47, %50 : vector<16x16xi32>
    %c0_i32_34 = arith.constant 0 : i32
    %52 = arith.cmpi slt, %45, %c0_i32_34 : i32
    %53 = vector.broadcast %52 : i1 to vector<16x16xi1>
    %54 = vector.broadcast %53 : vector<16x16xi1> to vector<16x16xi1>
    %55 = arith.xori %51, %54 : vector<16x16xi1>
    %56 = arith.andi %55, %49 : vector<16x16xi1>
    %57 = vector.broadcast %45 : i32 to vector<16x16xi32>
    %58 = arith.addi %47, %57 : vector<16x16xi32>
    %59 = arith.select %56, %58, %47 : vector<16x16xi1>, vector<16x16xi32>
    %c2_i32_35 = arith.constant 2 : i32
    %c0_i32_36 = arith.constant 0 : i32
    %60 = arith.cmpi eq, %c2_i32_35, %c0_i32_36 : i32
    %c1_i32_37 = arith.constant 1 : i32
    %61 = arith.select %60, %c1_i32_37, %c2_i32_35 : i32
    %62 = vector.broadcast %61 : i32 to vector<16x16xi32>
    %63 = arith.remsi %43, %62 : vector<16x16xi32>
    %c0_i32_38 = arith.constant 0 : i32
    %64 = vector.broadcast %c0_i32_38 : i32 to vector<16x16xi32>
    %65 = arith.cmpi ne, %63, %64 : vector<16x16xi32>
    %c0_i32_39 = arith.constant 0 : i32
    %66 = vector.broadcast %c0_i32_39 : i32 to vector<16x16xi32>
    %67 = arith.cmpi slt, %63, %66 : vector<16x16xi32>
    %c0_i32_40 = arith.constant 0 : i32
    %68 = arith.cmpi slt, %61, %c0_i32_40 : i32
    %69 = vector.broadcast %68 : i1 to vector<16x16xi1>
    %70 = vector.broadcast %69 : vector<16x16xi1> to vector<16x16xi1>
    %71 = arith.xori %67, %70 : vector<16x16xi1>
    %72 = arith.andi %71, %65 : vector<16x16xi1>
    %73 = vector.broadcast %61 : i32 to vector<16x16xi32>
    %74 = arith.addi %63, %73 : vector<16x16xi32>
    %75 = arith.select %72, %74, %63 : vector<16x16xi1>, vector<16x16xi32>
    %76 = arith.cmpi eq, %59, %75 : vector<16x16xi32>
    %77 = vector.extract_strided_slice %39 {offsets = [0, 0], sizes = [16, 8], strides = [1, 1]} : vector<16x32xbf16> to vector<16x8xbf16>
    %78 = vector.extract_strided_slice %40 {offsets = [0, 0], sizes = [16, 8], strides = [1, 1]} : vector<16x32xbf16> to vector<16x8xbf16>
    %79 = vector.extract_strided_slice %41 {offsets = [0, 0], sizes = [16, 8], strides = [1, 1]} : vector<16x32xbf16> to vector<16x8xbf16>
    %cst_41 = arith.constant dense<0.000000e+00> : vector<16x16xf32>
    %80 = tpu.matmul %77, %78, %cst_41 {dimension_numbers = #tpu.dot_dimension_numbers<[1], [1], [0], [0], [0, 0, 1, 0], [], []>} : vector<16x8xbf16>, vector<16x8xbf16>, vector<16x16xf32> -> vector<16x16xf32>
    %cst_42 = arith.constant -1.000000e+30 : f32
    %81 = vector.broadcast %cst_42 : f32 to vector<16x16xf32>
    %82 = arith.select %76, %80, %81 : vector<16x16xi1>, vector<16x16xf32>
    %cst_43 = arith.constant dense<0xFF800000> : vector<16xf32>
    %83 = vector.multi_reduction <maximumf>, %82, %cst_43 [1] : vector<16x16xf32> to vector<16xf32>
    %84 = vector.shape_cast %83 : vector<16xf32> to vector<16x1xf32>
    %85 = vector.broadcast %84 : vector<16x1xf32> to vector<16x16xf32>
    %86 = arith.subf %82, %85 : vector<16x16xf32>
    %87 = math.exp %86 : vector<16x16xf32>
    %cst_44 = arith.constant dense<0.000000e+00> : vector<16xf32>
    %88 = vector.multi_reduction <add>, %87, %cst_44 [1] : vector<16x16xf32> to vector<16xf32>
    %89 = vector.shape_cast %88 : vector<16xf32> to vector<16x1xf32>
    %90 = tpu.reciprocal %89 {approx = true} : vector<16x1xf32> -> vector<16x1xf32>
    %91 = vector.broadcast %90 : vector<16x1xf32> to vector<16x16xf32>
    %92 = arith.mulf %87, %91 : vector<16x16xf32>
    %93 = arith.truncf %92 : vector<16x16xf32> to vector<16x16xbf16>
    %cst_45 = arith.constant dense<0.000000e+00> : vector<16x8xf32>
    %94 = tpu.matmul %93, %79, %cst_45 {dimension_numbers = #tpu.dot_dimension_numbers<[1], [0], [0], [1], [0, 0, 1, 1], [], []>} : vector<16x16xbf16>, vector<16x8xbf16>, vector<16x8xf32> -> vector<16x8xf32>
    %c0_46 = arith.constant 0 : index
    %c0_47 = arith.constant 0 : index
    %95 = vector.load %arg17[%c0_46, %c0_47] : memref<16x32xf32, #tpu.memory_space<vmem>>, vector<16x8xf32>
    tpu.vector_store %arg17[%c0_46, %c0_47], %94 {strides = array<i32>} : memref<16x32xf32, #tpu.memory_space<vmem>>, vector<16x8xf32>,
    %96 = vector.extract_strided_slice %39 {offsets = [0, 8], sizes = [16, 8], strides = [1, 1]} : vector<16x32xbf16> to vector<16x8xbf16>
    %97 = vector.extract_strided_slice %40 {offsets = [0, 8], sizes = [16, 8], strides = [1, 1]} : vector<16x32xbf16> to vector<16x8xbf16>
    %98 = vector.extract_strided_slice %41 {offsets = [0, 8], sizes = [16, 8], strides = [1, 1]} : vector<16x32xbf16> to vector<16x8xbf16>
    %cst_48 = arith.constant dense<0.000000e+00> : vector<16x16xf32>
    %99 = tpu.matmul %96, %97, %cst_48 {dimension_numbers = #tpu.dot_dimension_numbers<[1], [1], [0], [0], [0, 0, 1, 0], [], []>} : vector<16x8xbf16>, vector<16x8xbf16>, vector<16x16xf32> -> vector<16x16xf32>
    %cst_49 = arith.constant -1.000000e+30 : f32
    %100 = vector.broadcast %cst_49 : f32 to vector<16x16xf32>
    %101 = arith.select %76, %99, %100 : vector<16x16xi1>, vector<16x16xf32>
    %cst_50 = arith.constant dense<0xFF800000> : vector<16xf32>
    %102 = vector.multi_reduction <maximumf>, %101, %cst_50 [1] : vector<16x16xf32> to vector<16xf32>
    %103 = vector.shape_cast %102 : vector<16xf32> to vector<16x1xf32>
    %104 = vector.broadcast %103 : vector<16x1xf32> to vector<16x16xf32>
    %105 = arith.subf %101, %104 : vector<16x16xf32>
    %106 = math.exp %105 : vector<16x16xf32>
    %cst_51 = arith.constant dense<0.000000e+00> : vector<16xf32>
    %107 = vector.multi_reduction <add>, %106, %cst_51 [1] : vector<16x16xf32> to vector<16xf32>
    %108 = vector.shape_cast %107 : vector<16xf32> to vector<16x1xf32>
    %109 = tpu.reciprocal %108 {approx = true} : vector<16x1xf32> -> vector<16x1xf32>
    %110 = vector.broadcast %109 : vector<16x1xf32> to vector<16x16xf32>
    %111 = arith.mulf %106, %110 : vector<16x16xf32>
    %112 = arith.truncf %111 : vector<16x16xf32> to vector<16x16xbf16>
    %cst_52 = arith.constant dense<0.000000e+00> : vector<16x8xf32>
    %113 = tpu.matmul %112, %98, %cst_52 {dimension_numbers = #tpu.dot_dimension_numbers<[1], [0], [0], [1], [0, 0, 1, 1], [], []>} : vector<16x16xbf16>, vector<16x8xbf16>, vector<16x8xf32> -> vector<16x8xf32>
    %c0_53 = arith.constant 0 : index
    %c8 = arith.constant 8 : index
    %114 = vector.load %arg17[%c0_53, %c8] : memref<16x32xf32, #tpu.memory_space<vmem>>, vector<16x8xf32>
    tpu.vector_store %arg17[%c0_53, %c8], %113 {strides = array<i32>} : memref<16x32xf32, #tpu.memory_space<vmem>>, vector<16x8xf32>,
    %115 = vector.extract_strided_slice %39 {offsets = [0, 16], sizes = [16, 8], strides = [1, 1]} : vector<16x32xbf16> to vector<16x8xbf16>
    %116 = vector.extract_strided_slice %40 {offsets = [0, 16], sizes = [16, 8], strides = [1, 1]} : vector<16x32xbf16> to vector<16x8xbf16>
    %117 = vector.extract_strided_slice %41 {offsets = [0, 16], sizes = [16, 8], strides = [1, 1]} : vector<16x32xbf16> to vector<16x8xbf16>
    %cst_54 = arith.constant dense<0.000000e+00> : vector<16x16xf32>
    %118 = tpu.matmul %115, %116, %cst_54 {dimension_numbers = #tpu.dot_dimension_numbers<[1], [1], [0], [0], [0, 0, 1, 0], [], []>} : vector<16x8xbf16>, vector<16x8xbf16>, vector<16x16xf32> -> vector<16x16xf32>
    %cst_55 = arith.constant -1.000000e+30 : f32
    %119 = vector.broadcast %cst_55 : f32 to vector<16x16xf32>
    %120 = arith.select %76, %118, %119 : vector<16x16xi1>, vector<16x16xf32>
    %cst_56 = arith.constant dense<0xFF800000> : vector<16xf32>
    %121 = vector.multi_reduction <maximumf>, %120, %cst_56 [1] : vector<16x16xf32> to vector<16xf32>
    %122 = vector.shape_cast %121 : vector<16xf32> to vector<16x1xf32>
    %123 = vector.broadcast %122 : vector<16x1xf32> to vector<16x16xf32>
    %124 = arith.subf %120, %123 : vector<16x16xf32>
    %125 = math.exp %124 : vector<16x16xf32>
    %cst_57 = arith.constant dense<0.000000e+00> : vector<16xf32>
    %126 = vector.multi_reduction <add>, %125, %cst_57 [1] : vector<16x16xf32> to vector<16xf32>
    %127 = vector.shape_cast %126 : vector<16xf32> to vector<16x1xf32>
    %128 = tpu.reciprocal %127 {approx = true} : vector<16x1xf32> -> vector<16x1xf32>
    %129 = vector.broadcast %128 : vector<16x1xf32> to vector<16x16xf32>
    %130 = arith.mulf %125, %129 : vector<16x16xf32>
    %131 = arith.truncf %130 : vector<16x16xf32> to vector<16x16xbf16>
    %cst_58 = arith.constant dense<0.000000e+00> : vector<16x8xf32>
    %132 = tpu.matmul %131, %117, %cst_58 {dimension_numbers = #tpu.dot_dimension_numbers<[1], [0], [0], [1], [0, 0, 1, 1], [], []>} : vector<16x16xbf16>, vector<16x8xbf16>, vector<16x8xf32> -> vector<16x8xf32>
    %c0_59 = arith.constant 0 : index
    %c16 = arith.constant 16 : index
    %133 = vector.load %arg17[%c0_59, %c16] : memref<16x32xf32, #tpu.memory_space<vmem>>, vector<16x8xf32>
    tpu.vector_store %arg17[%c0_59, %c16], %132 {strides = array<i32>} : memref<16x32xf32, #tpu.memory_space<vmem>>, vector<16x8xf32>,
    %134 = vector.extract_strided_slice %39 {offsets = [0, 24], sizes = [16, 8], strides = [1, 1]} : vector<16x32xbf16> to vector<16x8xbf16>
    %135 = vector.extract_strided_slice %40 {offsets = [0, 24], sizes = [16, 8], strides = [1, 1]} : vector<16x32xbf16> to vector<16x8xbf16>
    %136 = vector.extract_strided_slice %41 {offsets = [0, 24], sizes = [16, 8], strides = [1, 1]} : vector<16x32xbf16> to vector<16x8xbf16>
    %cst_60 = arith.constant dense<0.000000e+00> : vector<16x16xf32>
    %137 = tpu.matmul %134, %135, %cst_60 {dimension_numbers = #tpu.dot_dimension_numbers<[1], [1], [0], [0], [0, 0, 1, 0], [], []>} : vector<16x8xbf16>, vector<16x8xbf16>, vector<16x16xf32> -> vector<16x16xf32>
    %cst_61 = arith.constant -1.000000e+30 : f32
    %138 = vector.broadcast %cst_61 : f32 to vector<16x16xf32>
    %139 = arith.select %76, %137, %138 : vector<16x16xi1>, vector<16x16xf32>
    %cst_62 = arith.constant dense<0xFF800000> : vector<16xf32>
    %140 = vector.multi_reduction <maximumf>, %139, %cst_62 [1] : vector<16x16xf32> to vector<16xf32>
    %141 = vector.shape_cast %140 : vector<16xf32> to vector<16x1xf32>
    %142 = vector.broadcast %141 : vector<16x1xf32> to vector<16x16xf32>
    %143 = arith.subf %139, %142 : vector<16x16xf32>
    %144 = math.exp %143 : vector<16x16xf32>
    %cst_63 = arith.constant dense<0.000000e+00> : vector<16xf32>
    %145 = vector.multi_reduction <add>, %144, %cst_63 [1] : vector<16x16xf32> to vector<16xf32>
    %146 = vector.shape_cast %145 : vector<16xf32> to vector<16x1xf32>
    %147 = tpu.reciprocal %146 {approx = true} : vector<16x1xf32> -> vector<16x1xf32>
    %148 = vector.broadcast %147 : vector<16x1xf32> to vector<16x16xf32>
    %149 = arith.mulf %144, %148 : vector<16x16xf32>
    %150 = arith.truncf %149 : vector<16x16xf32> to vector<16x16xbf16>
    %cst_64 = arith.constant dense<0.000000e+00> : vector<16x8xf32>
    %151 = tpu.matmul %150, %136, %cst_64 {dimension_numbers = #tpu.dot_dimension_numbers<[1], [0], [0], [1], [0, 0, 1, 1], [], []>} : vector<16x16xbf16>, vector<16x8xbf16>, vector<16x8xf32> -> vector<16x8xf32>
    %c0_65 = arith.constant 0 : index
    %c24 = arith.constant 24 : index
    %152 = vector.load %arg17[%c0_65, %c24] : memref<16x32xf32, #tpu.memory_space<vmem>>, vector<16x8xf32>
    tpu.vector_store %arg17[%c0_65, %c24], %151 {strides = array<i32>} : memref<16x32xf32, #tpu.memory_space<vmem>>, vector<16x8xf32>,
    %c0_66 = arith.constant 0 : index
    %c0_67 = arith.constant 0 : index
    %153 = vector.load %arg17[%c0_66, %c0_67] : memref<16x32xf32, #tpu.memory_space<vmem>>, vector<16x32xf32>
    %154 = arith.truncf %153 : vector<16x32xf32> to vector<16x32xbf16>
    %c0_68 = arith.constant 0 : index
    %c0_69 = arith.constant 0 : index
    %155 = vector.load %arg14[%c0_68, %c0_69] : memref<32x32xbf16, #tpu.memory_space<vmem>>, vector<32x32xbf16>
    %cst_70 = arith.constant dense<0.000000e+00> : vector<16x32xf32>
    %156 = tpu.matmul %154, %155, %cst_70 {dimension_numbers = #tpu.dot_dimension_numbers<[1], [0], [0], [1], [0, 0, 1, 1], [], []>} : vector<16x32xbf16>, vector<32x32xbf16>, vector<16x32xf32> -> vector<16x32xf32>
    %c0_71 = arith.constant 0 : index
    %c0_72 = arith.constant 0 : index
    %157 = vector.load %arg15[%c0_71, %c0_72] : memref<1x32xf32, #tpu.memory_space<vmem>>, vector<1x32xf32>
    %158 = vector.broadcast %157 : vector<1x32xf32> to vector<16x32xf32>
    %159 = arith.addf %156, %158 : vector<16x32xf32>
    %160 = vector.shape_cast %159 : vector<16x32xf32> to vector<8x2x32xf32>
    %c0_73 = arith.constant 0 : index
    %c0_74 = arith.constant 0 : index
    %c0_75 = arith.constant 0 : index
    %161 = vector.load %arg16[%c0_73, %c0_74, %c0_75] : memref<8x2x32xf32, #tpu.memory_space<vmem>>, vector<8x2x32xf32>
    tpu.vector_store %arg16[%c0_73, %c0_74, %c0_75], %160 {strides = array<i32>} : memref<8x2x32xf32, #tpu.memory_space<vmem>>, vector<8x2x32xf32>,
    return
  }
  func.func @transform_0(%arg0: i32) -> (i32, i32, i32) {
    %c0_i32 = arith.constant 0 : i32
    %c0_i32_0 = arith.constant 0 : i32
    %c0_i32_1 = arith.constant 0 : i32
    return %c0_i32, %arg0, %c0_i32_0 : i32, i32, i32
  }
  func.func @transform_1(%arg0: i32) -> (i32, i32, i32) {
    %c0_i32 = arith.constant 0 : i32
    %c0_i32_0 = arith.constant 0 : i32
    %c0_i32_1 = arith.constant 0 : i32
    return %c0_i32, %arg0, %c0_i32_0 : i32, i32, i32
  }
  func.func @transform_2(%arg0: i32) -> (i32, i32, i32) {
    %c0_i32 = arith.constant 0 : i32
    %c0_i32_0 = arith.constant 0 : i32
    %c0_i32_1 = arith.constant 0 : i32
    return %c0_i32, %arg0, %c0_i32_0 : i32, i32, i32
  }
  func.func @transform_3(%arg0: i32) -> (i32, i32) {
    %c0_i32 = arith.constant 0 : i32
    %c0_i32_0 = arith.constant 0 : i32
    %c0_i32_1 = arith.constant 0 : i32
    return %c0_i32, %c0_i32_0 : i32, i32
  }
  func.func @transform_4(%arg0: i32) -> (i32, i32) {
    %c0_i32 = arith.constant 0 : i32
    %c0_i32_0 = arith.constant 0 : i32
    %c0_i32_1 = arith.constant 0 : i32
    return %c0_i32, %c0_i32_0 : i32, i32
  }
  func.func @transform_5(%arg0: i32) -> (i32, i32) {
    %c0_i32 = arith.constant 0 : i32
    %c0_i32_0 = arith.constant 0 : i32
    %c0_i32_1 = arith.constant 0 : i32
    return %c0_i32, %c0_i32_0 : i32, i32
  }
  func.func @transform_6(%arg0: i32) -> (i32, i32) {
    %c0_i32 = arith.constant 0 : i32
    %c0_i32_0 = arith.constant 0 : i32
    %c0_i32_1 = arith.constant 0 : i32
    return %c0_i32, %c0_i32_0 : i32, i32
  }
  func.func @transform_7(%arg0: i32) -> (i32, i32) {
    %c0_i32 = arith.constant 0 : i32
    %c0_i32_0 = arith.constant 0 : i32
    %c0_i32_1 = arith.constant 0 : i32
    return %c0_i32, %c0_i32_0 : i32, i32
  }
  func.func @transform_8(%arg0: i32) -> (i32, i32) {
    %c0_i32 = arith.constant 0 : i32
    %c0_i32_0 = arith.constant 0 : i32
    %c0_i32_1 = arith.constant 0 : i32
    return %c0_i32, %c0_i32_0 : i32, i32
  }
  func.func @transform_9(%arg0: i32) -> (i32, i32) {
    %c0_i32 = arith.constant 0 : i32
    %c0_i32_0 = arith.constant 0 : i32
    %c0_i32_1 = arith.constant 0 : i32
    return %c0_i32, %c0_i32_0 : i32, i32
  }
  func.func @transform_10(%arg0: i32) -> (i32, i32) {
    %c0_i32 = arith.constant 0 : i32
    %c0_i32_0 = arith.constant 0 : i32
    %c0_i32_1 = arith.constant 0 : i32
    return %c0_i32, %c0_i32_0 : i32, i32
  }
  func.func @transform_11(%arg0: i32) -> (i32, i32) {
    %c0_i32 = arith.constant 0 : i32
    %c0_i32_0 = arith.constant 0 : i32
    %c0_i32_1 = arith.constant 0 : i32
    return %c0_i32, %c0_i32_0 : i32, i32
  }
  func.func @transform_12(%arg0: i32) -> (i32, i32) {
    %c0_i32 = arith.constant 0 : i32
    %c0_i32_0 = arith.constant 0 : i32
    %c0_i32_1 = arith.constant 0 : i32
    return %c0_i32, %c0_i32_0 : i32, i32
  }
  func.func @transform_13(%arg0: i32) -> (i32, i32) {
    %c0_i32 = arith.constant 0 : i32
    %c0_i32_0 = arith.constant 0 : i32
    %c0_i32_1 = arith.constant 0 : i32
    return %c0_i32, %c0_i32_0 : i32, i32
  }
  func.func @transform_14(%arg0: i32) -> (i32, i32) {
    %c0_i32 = arith.constant 0 : i32
    %c0_i32_0 = arith.constant 0 : i32
    %c0_i32_1 = arith.constant 0 : i32
    return %c0_i32, %c0_i32_0 : i32, i32
  }
  func.func @transform_15(%arg0: i32) -> (i32, i32, i32) {
    %c0_i32 = arith.constant 0 : i32
    %c0_i32_0 = arith.constant 0 : i32
    %c0_i32_1 = arith.constant 0 : i32
    return %c0_i32, %arg0, %c0_i32_0 : i32, i32, i32
  }
}

</mosaic_0001>

<bundles_post_ra>
// kernel: tile.14
= control target key start
LH: loop header
LB: loop body
LE: loop exit
PB: predicated region body
PF: predicated region fallthrough
CT: control target
= control target key end

     0   :  { %vm36_vm0 = vcmask 1047556   ;;  %s81_s22 = smov 8   ;;  %s82_s23 = smov 16   ;;  %vm38_vm1 = vcmask 64512   ;;  %vm48_vm2 = vcmask 261312   ;;  %vm58_vm3 = vcmask 195712   ;;  %s133_s0 = inlined_call_operand.vmem [shape: f32[8,4,8], index: 0, kind: input, shape index: {}]   ;;  %s134_s1 = inlined_call_operand.vmem [shape: f32[8,32], index: 1, kind: output, shape index: {}]  }
   0x1   :  { %v70_v0 = vld [vmem:[%s133_s0 + $0x1c] sm:$0xf]  ;;  %v71_v1 = vld [vmem:[%s133_s0 + $0x18] sm:$0xf]  ;;  %v72_v2 = vld [vmem:[%s133_s0 + $0x14] sm:$0xf] }
   0x2   :  { %7 = vst [vmem:[#allocation0 + $0x38] sm:$0xf] %v70_v0  ;;  %v73_v3 = vld [vmem:[%s133_s0 + $0x10] sm:$0xf]  ;;  %v74_v4 = vld [vmem:[%s133_s0 + $0xc] sm:$0xf] }
   0x3   :  { %11 = vst [vmem:[#allocation0 + $0x30] sm:$0xf] %v71_v1  ;;  %v75_v5 = vld [vmem:[%s133_s0 + $0x8] sm:$0xf]  ;;  %v76_v6 = vld [vmem:[%s133_s0 + $0x4] sm:$0xf] }
   0x4   :  { %15 = vst [vmem:[#allocation0 + $0x28] sm:$0xf] %v72_v2  ;;  %v32_v7 = vld [vmem:[%s133_s0] sm:$0xf]  ;;  %s80_s0 = smov 24   ;;  %vm68_vm4 = vcmask 130112  }
   0x5   :  { %19 = vst [vmem:[#allocation0 + $0x20] sm:$0xf] %v73_v3 }
   0x6   :  { %23 = vst [vmem:[#allocation0 + $0x18] sm:$0xf] %v74_v4 }
   0x7   :  { %27 = vst [vmem:[#allocation0 + $0x10] sm:$0xf] %v75_v5 }
   0x8   :  { %31 = vst [vmem:[#allocation0 + $0x8] sm:$0xf] %v76_v6 }
   0x9   :  { %33 = vst [vmem:[#allocation0] sm:$0xf] %v32_v7 }
   0xc   :  { %v43_v8 = vld [vmem:[#allocation0 + $0x3] ss:$8 sm:$0xf0]   ;;  %v63_v9 = vld [vmem:[#allocation0 + $0x1] ss:$8 sm:$0xf0]  }
   0xd   :  { %v53_v15 = vld [vmem:[#allocation0 + $0x2] ss:$8 sm:$0xf0]   ;;  %v35_v18 = vld [vmem:[#allocation0] ss:$8 sm:$0xf0]  }
  0x10   :  { %v41_v10 = vld [vmem:[#allocation0 + $0x3] ss:$8 sm:$0xf]   ;;  %v61_v12 = vld [vmem:[#allocation0 + $0x1] ss:$8 sm:$0xf]  }
  0x11   :  { %v45_v11 = vsel %vm36_vm0, %v43_v8, %v41_v10  ;;  %v65_v13 = vsel %vm36_vm0, %v63_v9, %v61_v12  ;;  %v51_v14 = vld [vmem:[#allocation0 + $0x2] ss:$8 sm:$0xf]   ;;  %v34_v17 = vld [vmem:[#allocation0] ss:$8 sm:$0xf]  }
  0x12   :  { %46 = vrot.lane.b32.xlu0 %v45_v11, %s80_s0  ;;  %66 = vrot.lane.b32.xlu1 %v65_v13, %s81_s22  ;;  %v55_v16 = vsel %vm36_vm0, %v53_v15, %v51_v14  ;;  %v37_v19 = vsel %vm36_vm0, %v35_v18, %v34_v17 }
  0x13   :  { %39 = vst.msk [vmem:[%s134_s1] sm:$0xff] %vm38_vm1, %v37_v19  }
  0x1a   :  { %56 = vrot.lane.b32.xlu0 %v55_v16, %s82_s23 }
  0x84   :  { %v47_v20 = vpop.permute.xlu0 %46   ;;  %v67_v21 = vpop.permute.xlu1 %66  }
  0x85   :  { %49 = vst.msk [vmem:[%s134_s1] sm:$0xff] %vm48_vm2, %v47_v20  }
  0x8c   :  { %v57_v22 = vpop.permute.xlu0 %56  }
  0x8d   :  { %59 = vst.msk [vmem:[%s134_s1] sm:$0xff] %vm58_vm3, %v57_v22  }
  0x8e   :  { %69 = vst.msk [vmem:[%s134_s1] sm:$0xff] %vm68_vm4, %v67_v21  }

// kernel: rotary_mha_forward.1
= control target key start
LH: loop header
LB: loop body
LE: loop exit
PB: predicated region body
PF: predicated region fallthrough
CT: control target
= control target key end

     0   :  { %s1462_s0 = inlined_call_operand.vmem [shape: bf16[8,2,32], index: 0, kind: input, shape index: {}]   ;;  %s1463_s1 = inlined_call_operand.vmem [shape: bf16[8,2,32], index: 1, kind: input, shape index: {}]   ;;  %s1464_s2 = inlined_call_operand.vmem [shape: bf16[8,2,32], index: 2, kind: input, shape index: {}]   ;;  %s1465_s3 = inlined_call_operand.vmem [shape: f32[16,32], index: 3, kind: input, shape index: {}]   ;;  %s1466_s4 = inlined_call_operand.vmem [shape: f32[16,32], index: 4, kind: input, shape index: {}]   ;;  %s1467_s5 = inlined_call_operand.vmem [shape: bf16[32,32], index: 5, kind: input, shape index: {}]   ;;  %s1468_s6 = inlined_call_operand.vmem [shape: bf16[32,32], index: 6, kind: input, shape index: {}]   ;;  %s1469_s7 = inlined_call_operand.vmem [shape: f32[1,32], index: 7, kind: input, shape index: {}]   ;;  %s1470_s8 = inlined_call_operand.vmem [shape: bf16[32,32], index: 8, kind: input, shape index: {}]   ;;  %s1471_s9 = inlined_call_operand.vmem [shape: bf16[32,32], index: 9, kind: input, shape index: {}]   ;;  %s1472_s10 = inlined_call_operand.vmem [shape: f32[1,32], index: 10, kind: input, shape index: {}]   ;;  %s1473_s11 = inlined_call_operand.vmem [shape: bf16[32,32], index: 11, kind: input, shape index: {}]   ;;  %s1474_s12 = inlined_call_operand.vmem [shape: f32[1,32], index: 12, kind: input, shape index: {}]   ;;  %s1475_s13 = inlined_call_operand.vmem [shape: bf16[32,32], index: 13, kind: input, shape index: {}]   ;;  %s1476_s14 = inlined_call_operand.vmem [shape: f32[1,32], index: 14, kind: input, shape index: {}]   ;;  %s1477_s15 = inlined_call_operand.hbm [shape: f32[8,2,32], index: 15, kind: output, shape index: {}]  }
   0x1   :  { %v992_v0 = vld [vmem:[%s1470_s8 + $0x8] sm:$0xff]  ;;  %v1171_v3 = vld [vmem:[%s1465_s3] sm:$0xff] }
   0x2   :  { %v990_v1 = vld [vmem:[%s1468_s6 + $0x8] sm:$0xff]  ;;  %399 = vmatpush.bf16.msra.mxu3 %v992_v0  ;;  %v991_v4 = vld [vmem:[%s1470_s8] sm:$0xff]  ;;  %v98_v6 = vrot.slane %v1171_v3, 2  ;;  %v99_v7 = vrot.slane %v1171_v3, 4  ;;  %v100_v27 = vrot.slane %v1171_v3, 6 }
   0x3   :  { %v988_v2 = vld [vmem:[%s1467_s5 + $0x8] sm:$0xff]  ;;  %298 = vmatpush.bf16.msra.mxu0 %v990_v1  ;;  %v56_v5 = vld [vmem:[%s1462_s0] sm:$0x1]  ;;  %v57_v8 = vld [vmem:[%s1462_s0 + $0x1] sm:$0x1] }
   0x4   :  { %327 = vmatpush.bf16.msra.mxu1 %v988_v2  ;;  %v58_v9 = vld [vmem:[%s1462_s0 + $0x2] sm:$0x1]  ;;  %v59_v10 = vld [vmem:[%s1462_s0 + $0x3] sm:$0x1]  ;;  %v64_v11 = vunpack.c.l.bf16 %v56_v5  ;;  %v60_v12 = vld [vmem:[%s1462_s0 + $0x4] sm:$0x1]  ;;  %v65_v15 = vunpack.c.l.bf16 %v57_v8 }
   0x5   :  { %v61_v13 = vld [vmem:[%s1462_s0 + $0x5] sm:$0x1]  ;;  %v62_v14 = vld [vmem:[%s1462_s0 + $0x6] sm:$0x1]  ;;  %v66_v16 = vunpack.c.l.bf16 %v58_v9  ;;  %v1202_v17 = vld [vmem:[%s1462_s0 + $0x7] sm:$0x1]  ;;  %v68_v18 = vunpack.c.l.bf16 %v60_v12  ;;  %v67_v21 = vunpack.c.l.bf16 %v59_v10 }
   0x6   :  { %v110_v19 = vmul.f32 %v64_v11, %v1171_v3  ;;  %400 = vmatpush.bf16.msra.mxu3 %v991_v4  ;;  %v1208_v20 = vld [vmem:[%s1465_s3 + $0x8] sm:$0xff]  ;;  %v111_v22 = vmul.f32 %v98_v6, %v65_v15  ;;  %v69_v23 = vunpack.c.l.bf16 %v61_v13  ;;  %v70_v24 = vunpack.c.l.bf16 %v62_v14  ;;  %v1219_v28 = vld [vmem:[%s1466_s4] sm:$0xff] }
   0x7   :  { %v71_v25 = vunpack.c.l.bf16 %v1202_v17  ;;  %v112_v26 = vmul.f32 %v99_v7, %v66_v16  ;;  %v101_v29 = vrot.slane %v1208_v20, 2  ;;  %v102_v30 = vrot.slane %v1208_v20, 4 }
   0x8   :  { %126 = vst [vmem:[#allocation1] ss:$4 sm:$0xff] %v110_v19  ;;  %v103_v31 = vrot.slane %v1208_v20, 6  ;;  %v114_v32 = vmul.f32 %v68_v18, %v1208_v20  ;;  %v113_v33 = vmul.f32 %v100_v27, %v67_v21  ;;  %v148_v37 = vrot.slane %v1219_v28, 2 }
   0x9   :  { %128 = vst [vmem:[#allocation1 + $0x1] ss:$4 sm:$0xff] %v111_v22  ;;  %v115_v34 = vmul.f32 %v101_v29, %v69_v23  ;;  %v116_v35 = vmul.f32 %v102_v30, %v70_v24 }
   0xa   :  { %130 = vst [vmem:[#allocation1 + $0x2] ss:$4 sm:$0xff] %v112_v26  ;;  %v117_v36 = vmul.f32 %v103_v31, %v71_v25 }
   0xb   :  { %134 = vst [vmem:[#allocation1 + $0x20] ss:$4 sm:$0xff] %v114_v32 }
   0xc   :  { %132 = vst [vmem:[#allocation1 + $0x3] ss:$4 sm:$0xff] %v113_v33 }
   0xd   :  { %136 = vst [vmem:[#allocation1 + $0x21] ss:$4 sm:$0xff] %v115_v34 }
   0xe   :  { %20 = vsyncpa [#allocation4], 0  ;;  %v1237_v38 = vld [vmem:[%s1466_s4 + $0x8] sm:$0xff]  ;;  %138 = vst [vmem:[#allocation1 + $0x22] ss:$4 sm:$0xff] %v116_v35  ;;  %v149_v39 = vrot.slane %v1219_v28, 4  ;;  %v160_v42 = vmul.f32 %v64_v11, %v1219_v28  ;;  %v161_v46 = vmul.f32 %v148_v37, %v65_v15 }
   0xf   :  { %140 = vst [vmem:[#allocation1 + $0x23] ss:$4 sm:$0xff] %v117_v36  ;;  %v150_v40 = vrot.slane %v1219_v28, 6  ;;  %v994_v41 = vld [vmem:[%s1471_s9 + $0x8] sm:$0xff]  ;;  %v989_v43 = vld [vmem:[%s1468_s6] sm:$0xff]  ;;  %v151_v45 = vrot.slane %v1237_v38, 2  ;;  %v164_v54 = vmul.f32 %v68_v18, %v1237_v38 }
  0x10   :  { %v987_v44 = vld [vmem:[%s1467_s5] sm:$0xff]  ;;  %370 = vmatpush.bf16.msra.mxu2 %v994_v41  ;;  %v152_v48 = vrot.slane %v1237_v38, 4  ;;  %v162_v49 = vmul.f32 %v149_v39, %v66_v16  ;;  %299 = vmatpush.bf16.msra.mxu0 %v989_v43  ;;  %v153_v51 = vrot.slane %v1237_v38, 6  ;;  %vm288_vm0 = vcmask 261120   ;;  %s1070_s8 = smov 112   ;;  %s1071_s20 = smov 104  }
  0x11   :  { %v993_v47 = vld [vmem:[%s1471_s9] sm:$0xff]  ;;  %328 = vmatpush.bf16.msra.mxu1 %v987_v44  ;;  %v163_v52 = vmul.f32 %v150_v40, %v67_v21  ;;  %v165_v57 = vmul.f32 %v151_v45, %v69_v23  ;;  %vm532_vm1 = vcmask 64512   ;;  %s1072_s4 = smov 120   ;;  %vm555_vm3 = vcmask 130048   ;;  %s913_s23 = sshll.u32 %s1477_s15, 4  ;;  %s914_s23 = int_to_ptr.hbm [resolvable:$true] %s913_s23 }
  0x12   :  { %v72_v53 = vld [vmem:[%s1463_s1] sm:$0x1]  ;;  %v73_v55 = vld [vmem:[%s1463_s1 + $0x1] sm:$0x1]  ;;  %v74_v56 = vld [vmem:[%s1463_s1 + $0x2] sm:$0x1]  ;;  %v166_v59 = vmul.f32 %v152_v48, %v70_v24  ;;  %v167_v62 = vmul.f32 %v153_v51, %v71_v25 }
  0x13   :  { %v141_v50 = vld.sshfl [vmem:[#allocation1] sm:$0xff pattern:$0x73625140]  ;;  %v80_v61 = vunpack.c.l.bf16 %v72_v53  ;;  %v81_v1 = vunpack.c.l.bf16 %v73_v55  ;;  %v82_v4 = vunpack.c.l.bf16 %v74_v56  ;;  %vm681_vm5 = vcmask 130112   ;;  %s1077_s24 = smov 32   ;;  %s1078_s25 = smov 2  }
  0x14   :  { %176 = vst [vmem:[#allocation1] ss:$4 sm:$0xff] %v160_v42  ;;  %371 = vmatpush.bf16.msra.mxu2 %v993_v47  ;;  %v75_v60 = vld [vmem:[%s1463_s1 + $0x3] sm:$0x1]  ;;  %v76_v0 = vld [vmem:[%s1463_s1 + $0x4] sm:$0x1] }
  0x15   :  { %178 = vst [vmem:[#allocation1 + $0x1] ss:$4 sm:$0xff] %v161_v46  ;;  %v77_v2 = vld [vmem:[%s1463_s1 + $0x5] sm:$0x1]  ;;  %v78_v5 = vld [vmem:[%s1463_s1 + $0x6] sm:$0x1]  ;;  %v83_v8 = vunpack.c.l.bf16 %v75_v60  ;;  %v84_v10 = vunpack.c.l.bf16 %v76_v0  ;;  %v196_v11 = vmul.f32 %v80_v61, %v1171_v3  ;;  %v197_v13 = vmul.f32 %v98_v6, %v81_v1 }
  0x16   :  { %v142_v58 = vld.sshfl [vmem:[#allocation1 + $0x20] sm:$0xff pattern:$0x73625140]  ;;  %180 = vst [vmem:[#allocation1 + $0x2] ss:$4 sm:$0xff] %v162_v49  ;;  %v85_v12 = vunpack.c.l.bf16 %v77_v2  ;;  %v86_v14 = vunpack.c.l.bf16 %v78_v5  ;;  %v198_v15 = vmul.f32 %v99_v7, %v82_v4  ;;  %v232_v3 = vmul.f32 %v80_v61, %v1219_v28 }
  0x17   :  { %182 = vst [vmem:[#allocation1 + $0x3] ss:$4 sm:$0xff] %v163_v52  ;;  %v145_v63 = vpack.c.bf16 %v142_v58, %v141_v50  ;;  %v79_v9 = vld [vmem:[%s1463_s1 + $0x7] sm:$0x1]  ;;  %v199_v18 = vmul.f32 %v100_v27, %v83_v8  ;;  %v200_v19 = vmul.f32 %v84_v10, %v1208_v20  ;;  %v233_v24 = vmul.f32 %v148_v37, %v81_v1  ;;  %v1009_v53 = vld [vmem:[%s1472_s10] ss:$0 sm:$0xff] }
  0x18   :  { %184 = vst [vmem:[#allocation1 + $0x20] ss:$4 sm:$0xff] %v164_v54  ;;  %v87_v16 = vunpack.c.l.bf16 %v79_v9  ;;  %v201_v21 = vmul.f32 %v101_v29, %v85_v12  ;;  %v202_v22 = vmul.f32 %v102_v30, %v86_v14  ;;  %v234_v25 = vmul.f32 %v149_v39, %v82_v4 }
  0x19   :  { %186 = vst [vmem:[#allocation1 + $0x21] ss:$4 sm:$0xff] %v165_v57  ;;  %942 = vmatmul.msk.bf16.vlgmr.msra.gmra.mxu1 %vm288_vm0, %v145_v63  ;;  %v235_v20 = vmul.f32 %v150_v40, %v83_v8  ;;  %v236_v27 = vmul.f32 %v84_v10, %v1237_v38  ;;  %v237_v29 = vmul.f32 %v151_v45, %v85_v12  ;;  %v1008_v38 = vld [vmem:[%s1469_s7] ss:$0 sm:$0xff]  ;;  %v479_v8 = vlaneseq }
  0x1a   :  { %188 = vst [vmem:[#allocation1 + $0x22] ss:$4 sm:$0xff] %v166_v59  ;;  %v203_v7 = vmul.f32 %v103_v31, %v87_v16  ;;  %v238_v30 = vmul.f32 %v152_v48, %v86_v14  ;;  %v239_v32 = vmul.f32 %v153_v51, %v87_v16  ;;  %vm761_vm6 = vcmask 195712  }
  0x1b   :  { %190 = vst [vmem:[#allocation1 + $0x23] ss:$4 sm:$0xff] %v167_v62  ;;  %v483_v14 = vand.u32 127, %v479_v8  ;;  %vm841_vm7 = vcmask 261312   ;;  %vm898_vm8 = vcmask 254976  }
  0x1d   :  { %v512_v16 = vand.u32 1, %v483_v14 }
  0x1e   :  { %v191_v17 = vld.sshfl [vmem:[#allocation1] sm:$0xff pattern:$0x73625140] }
  0x1f   :  { %212 = vst [vmem:[#allocation1] ss:$4 sm:$0xff] %v196_v11 }
  0x20   :  { %214 = vst [vmem:[#allocation1 + $0x1] ss:$4 sm:$0xff] %v197_v13  ;;  %v480_v13 = vshrl.u32 %v479_v8, 7 }
  0x21   :  { %216 = vst [vmem:[#allocation1 + $0x2] ss:$4 sm:$0xff] %v198_v15 }
  0x22   :  { %v192_v6 = vld.sshfl [vmem:[#allocation1 + $0x20] sm:$0xff pattern:$0x73625140]  ;;  %218 = vst [vmem:[#allocation1 + $0x3] ss:$4 sm:$0xff] %v199_v18  ;;  %v488_v15 = vand.u32 1, %v480_v13 }
  0x23   :  { %220 = vst [vmem:[#allocation1 + $0x20] ss:$4 sm:$0xff] %v200_v19  ;;  %v195_v23 = vpack.c.bf16 %v192_v6, %v191_v17  ;;  %v481_v18 = vadd.s32 8, %v480_v13 }
  0x24   :  { %222 = vst [vmem:[#allocation1 + $0x21] ss:$4 sm:$0xff] %v201_v21  ;;  %vm1345_vm2 = vcmp.eq.s32.totalorder %v488_v15, %v512_v16 }
  0x25   :  { %224 = vst [vmem:[#allocation1 + $0x22] ss:$4 sm:$0xff] %v202_v22  ;;  %933 = vmatmul.msk.bf16.vlgmr.msra.gmra.mxu0 %vm288_vm0, %v195_v23  ;;  %v495_v6 = vand.u32 1, %v481_v18 }
  0x26   :  { %226 = vst [vmem:[#allocation1 + $0x23] ss:$4 sm:$0xff] %v203_v7 }
  0x27   :  { %vm1353_vm4 = vcmp.eq.s32.totalorder %v495_v6, %v512_v16 }
  0x29   :  { %v227_v26 = vld.sshfl [vmem:[#allocation1] sm:$0xff pattern:$0x73625140] }
  0x2a   :  { %248 = vst [vmem:[#allocation1] ss:$4 sm:$0xff] %v232_v3 }
  0x2b   :  { %250 = vst [vmem:[#allocation1 + $0x1] ss:$4 sm:$0xff] %v233_v24 }
  0x2c   :  { %252 = vst [vmem:[#allocation1 + $0x2] ss:$4 sm:$0xff] %v234_v25 }
  0x2d   :  { %v228_v31 = vld.sshfl [vmem:[#allocation1 + $0x20] sm:$0xff pattern:$0x73625140]  ;;  %254 = vst [vmem:[#allocation1 + $0x3] ss:$4 sm:$0xff] %v235_v20 }
  0x2e   :  { %v231_v33 = vpack.c.bf16 %v228_v31, %v227_v26  ;;  %256 = vst [vmem:[#allocation1 + $0x20] ss:$4 sm:$0xff] %v236_v27  ;;  %v996_v26 = vld [vmem:[%s1473_s11 + $0x8] sm:$0xff]  ;;  %v88_v20 = vld [vmem:[%s1464_s2] sm:$0x1] }
  0x2f   :  { %258 = vst [vmem:[#allocation1 + $0x21] ss:$4 sm:$0xff] %v237_v29  ;;  %v89_v27 = vld [vmem:[%s1464_s2 + $0x1] sm:$0x1]  ;;  %465 = vmatpush.bf16.msrb.mxu0 %v996_v26  ;;  %v90_v29 = vld [vmem:[%s1464_s2 + $0x2] sm:$0x1] }
  0x30   :  { %960 = vmatmul.msk.bf16.vlgmr.msra.gmra.mxu3 %vm288_vm0, %v231_v33  ;;  %260 = vst [vmem:[#allocation1 + $0x22] ss:$4 sm:$0xff] %v238_v30  ;;  %v91_v30 = vld [vmem:[%s1464_s2 + $0x3] sm:$0x1]  ;;  %v93_v33 = vld [vmem:[%s1464_s2 + $0x5] sm:$0x1] }
  0x31   :  { %262 = vst [vmem:[#allocation1 + $0x23] ss:$4 sm:$0xff] %v239_v32  ;;  %v995_v31 = vld [vmem:[%s1473_s11] sm:$0xff] }
  0x32   :  { %v92_v32 = vld [vmem:[%s1464_s2 + $0x4] sm:$0x1] }
  0x33   :  { %466 = vmatpush.bf16.msrb.mxu0 %v995_v31 }
  0x34   :  { %v263_v28 = vld.sshfl [vmem:[#allocation1] sm:$0xff pattern:$0x73625140] }
  0x35   :  { %434 = vst [vmem:[#allocation1 + $0x4] ss:$9 sm:$0xff] %v92_v32 }
  0x38   :  { %v264_v34 = vld.sshfl [vmem:[#allocation1 + $0x20] sm:$0xff pattern:$0x73625140] }
  0x39   :  { %v267_v35 = vpack.c.bf16 %v264_v34, %v263_v28  ;;  %422 = vst [vmem:[#allocation1] ss:$9 sm:$0xff] %v88_v20  ;;  %v94_v28 = vld [vmem:[%s1464_s2 + $0x6] sm:$0x1]  ;;  %v95_v34 = vld [vmem:[%s1464_s2 + $0x7] sm:$0x1] }
  0x3a   :  { %425 = vst [vmem:[#allocation1 + $0x1] ss:$9 sm:$0xff] %v89_v27 }
  0x3b   :  { %951 = vmatmul.msk.bf16.vlgmr.msra.gmra.mxu2 %vm288_vm0, %v267_v35  ;;  %428 = vst [vmem:[#allocation1 + $0x2] ss:$9 sm:$0xff] %v90_v29 }
  0x3c   :  { %431 = vst [vmem:[#allocation1 + $0x3] ss:$9 sm:$0xff] %v91_v30 }
  0x3d   :  { %437 = vst [vmem:[#allocation1 + $0x5] ss:$9 sm:$0xff] %v93_v33 }
  0x3e   :  { %440 = vst [vmem:[#allocation1 + $0x6] ss:$9 sm:$0xff] %v94_v28 }
  0x3f   :  { %443 = vst [vmem:[#allocation1 + $0x7] ss:$9 sm:$0xff] %v95_v34 }
  0x46   :  { %v444_v35 = vld [vmem:[#allocation1] sm:$0xff] }
  0x47   :  { %969 = vmatmul.msk.bf16.vlgmr.msrb.gmra.mxu0 %vm288_vm0, %v444_v35 }
  0x96   :  { %v330_v36 = vpop.f32.mrf.mxu1 }
  0x9e   :  { %v332_v41 = vpop.f32.mrf.mxu1 }
  0xa2   :  { %v301_v37 = vpop.f32.mrf.mxu0 }
  0xa3   :  { %v331_v39 = vadd.f32 %v330_v36, %v301_v37 }
  0xa5   :  { %v339_v40 = vadd.f32 %v1008_v38, %v331_v39 }
  0xa7   :  { %v473_v43 = vpack.c.bf16 %v339_v40, %v339_v40 }
  0xa9   :  { %v524_v46 = vunpack.c.l.b16 %v473_v43 }
  0xaa   :  { %v303_v42 = vpop.f32.mrf.mxu0 }
  0xab   :  { %v333_v44 = vadd.f32 %v332_v41, %v303_v42 }
  0xad   :  { %v340_v45 = vadd.f32 %v1008_v38, %v333_v44 }
  0xaf   :  { %v474_v47 = vpack.c.bf16 %v340_v45, %v340_v45 }
  0xb1   :  { %v525_v48 = vunpack.c.l.b16 %v474_v47 }
  0xb3   :  { %v526_v49 = vpack.c.b16 %v525_v48, %v524_v46  ;;  %v402_v50 = vpop.f32.mrf.mxu3 }
  0xb5   :  { %684 = vrot.lane.b32.xlu2 %v526_v49, %s1070_s8 }
  0xbb   :  { %v404_v55 = vpop.f32.mrf.mxu3 }
  0xbd   :  { %764 = vrot.lane.b32.xlu2 %v526_v49, %s1071_s20 }
  0xbe   :  { %v373_v51 = vpop.f32.mrf.mxu2 }
  0xbf   :  { %v403_v52 = vadd.f32 %v402_v50, %v373_v51 }
  0xc1   :  { %v411_v54 = vadd.f32 %v1009_v53, %v403_v52 }
  0xc3   :  { %v475_v58 = vpack.c.bf16 %v411_v54, %v411_v54 }
  0xc5   :  { %v529_v61 = vunpack.c.l.b16 %v475_v58 }
  0xc6   :  { %v375_v56 = vpop.f32.mrf.mxu2 }
  0xc7   :  { %v405_v57 = vadd.f32 %v404_v55, %v375_v56 }
  0xc9   :  { %v412_v59 = vadd.f32 %v1009_v53, %v405_v57 }
  0xcb   :  { %v476_v60 = vpack.c.bf16 %v412_v59, %v412_v59 }
  0xcd   :  { %v530_v62 = vunpack.c.l.b16 %v476_v60 }
  0xcf   :  { %v531_v63 = vpack.c.b16 %v530_v62, %v529_v61 }
  0xd1   :  { %686 = vrot.lane.b32.xlu1 %v531_v63, %s1070_s8  ;;  %606 = vrot.lane.b32.xlu0 %v531_v63, %s1072_s4  ;;  %v537_v0 = vsel %vm532_vm1, %v531_v63, 0 }
  0xd2   :  { %546 = vmatpush.bf16.xpose.msrb.mxu1 %v537_v0  ;;  %v1010_v0 = vld [vmem:[%s1474_s12] ss:$0 sm:$0xff]  ;;  %s1073_s12 = smov 8  }
  0xd9   :  { %766 = vrot.lane.b32.xlu1 %v531_v63, %s1071_s20  ;;  %604 = vrot.lane.b32.xlu0 %v526_v49, %s1072_s4 }
  0xda   :  { %970 = vmatmul.msk.bf16.vlgmr.msrb.gmra.mxu1 %vm532_vm1, %v526_v49 }
 0x10f   :  { %v685_v9 = vpop.permute.xlu2 %684 }
 0x117   :  { %v765_v7 = vpop.permute.xlu2 %764 }
 0x143   :  { %v687_v1 = vpop.permute.xlu1 %686  ;;  %v607_v2 = vpop.permute.xlu0 %606 }
 0x144   :  { %v692_v4 = vsel %vm532_vm1, %v687_v1, 0  ;;  %v612_v5 = vsel %vm532_vm1, %v607_v2, 0  ;;  %v468_v2 = vpop.f32.mrf.mxu0 }
 0x145   :  { %621 = vmatpush.bf16.xpose.msrb.mxu3 %v612_v5  ;;  %701 = vmatpush.bf16.xpose.msra.mxu1 %v692_v4  ;;  %v469_v8 = vadd.f32 %v1010_v0, %v468_v2 }
 0x14b   :  { %v767_v10 = vpop.permute.xlu1 %766  ;;  %v605_v11 = vpop.permute.xlu0 %604 }
 0x14c   :  { %v772_v12 = vsel %vm532_vm1, %v767_v10, 0  ;;  %972 = vmatmul.msk.bf16.vlgmr.msrb.gmra.mxu3 %vm532_vm1, %v605_v11  ;;  %974 = vmatmul.msk.bf16.vlgmr.msra.gmra.mxu1 %vm532_vm1, %v685_v9  ;;  %v477_v11 = vpack.c.bf16 %v469_v8, %v469_v8  ;;  %v470_v13 = vpop.f32.mrf.mxu0 }
 0x14d   :  { %781 = vmatpush.bf16.xpose.msra.mxu3 %v772_v12  ;;  %v471_v16 = vadd.f32 %v1010_v0, %v470_v13 }
 0x157   :  { %v548_v19 = vpop.f32.mrf.mxu1 }
 0x158   :  { %v553_v21 = vsel %vm1345_vm2, %v548_v19, -1e+30  ;;  %v581_v19 = vunpack.c.l.b16 %v477_v11 }
 0x159   :  { %v556_v22 = vsel %vm555_vm3, %v553_v21, -inf }
 0x15a   :  { %557 = vmax.xlane.f32.xlu0 %v556_v22 }
 0x15c   :  { %976 = vmatmul.msk.bf16.vlgmr.msra.gmra.mxu3 %vm532_vm1, %v765_v7 }
 0x15f   :  { %v550_v3 = vpop.f32.mrf.mxu1 }
 0x160   :  { %v554_v24 = vsel %vm1353_vm4, %v550_v3, -1e+30 }
 0x161   :  { %v559_v25 = vsel %vm555_vm3, %v554_v24, -inf }
 0x162   :  { %560 = vmax.xlane.f32.xlu1 %v559_v25 }
 0x1c9   :  { %v703_v36 = vpop.f32.mrf.mxu1 }
 0x1ca   :  { %v708_v37 = vsel %vm1345_vm2, %v703_v36, -1e+30 }
 0x1cb   :  { %v710_v39 = vsel %vm555_vm3, %v708_v37, -inf }
 0x1cc   :  { %711 = vmax.xlane.f32.xlu0 %v710_v39 }
 0x1cd   :  { %v558_v38 = vpop.xlane.xlu0 %557 }
 0x1ce   :  { %v562_v40 = vsub.f32 %v553_v21, %v558_v38  ;;  %v478_v21 = vpack.c.bf16 %v471_v16, %v471_v16 }
 0x1cf   :  { %v623_v41 = vpop.f32.mrf.mxu3 }
 0x1d0   :  { %v564_v42 = vmul.f32 1.442695, %v562_v40  ;;  %v628_v43 = vsel %vm1345_vm2, %v623_v41, -1e+30  ;;  %v582_v6 = vunpack.c.l.b16 %v478_v21 }
 0x1d1   :  { %v705_v44 = vpop.f32.mrf.mxu1  ;;  %v630_v45 = vsel %vm555_vm3, %v628_v43, -inf }
 0x1d2   :  { %1012 = vpow2.f32 %v564_v42  ;;  %v709_v46 = vsel %vm1353_vm4, %v705_v44, -1e+30  ;;  %631 = vmax.xlane.f32.xlu2 %v630_v45  ;;  %v583_v3 = vpack.c.b16 %v582_v6, %v581_v19  ;;  %v997_v6 = vld [vmem:[%s1475_s13] sm:$0xff] }
 0x1d3   :  { %v713_v47 = vsel %vm555_vm3, %v709_v46, -inf }
 0x1d4   :  { %714 = vmax.xlane.f32.xlu1 %v713_v47  ;;  %595 = vmatpush.bf16.msrb.mxu2 %v583_v3 }
 0x1d5   :  { %v561_v48 = vpop.xlane.xlu1 %560 }
 0x1d6   :  { %v563_v51 = vsub.f32 %v554_v24, %v561_v48 }
 0x1d7   :  { %v625_v49 = vpop.f32.mrf.mxu3 }
 0x1d8   :  { %v1400_v50 = vpop.eup %1012  ;;  %v629_v52 = vsel %vm1353_vm4, %v625_v49, -1e+30  ;;  %v566_v55 = vmul.f32 1.442695, %v563_v51 }
 0x1d9   :  { %v633_v53 = vsel %vm555_vm3, %v629_v52, -inf  ;;  %v568_v54 = vsel %vm555_vm3, %v1400_v50, 0.0 }
 0x1da   :  { %634 = vmax.xlane.f32.xlu2 %v633_v53  ;;  %1014 = vpow2.f32 %v566_v55 }
 0x1dc   :  { %569 = vadd.xlane.f32.xlu1 %v568_v54 }
 0x1df   :  { %v783_v56 = vpop.f32.mrf.mxu3 }
 0x1e0   :  { %v788_v57 = vsel %vm1345_vm2, %v783_v56, -1e+30  ;;  %v1410_v59 = vpop.eup %1014 }
 0x1e1   :  { %v790_v58 = vsel %vm555_vm3, %v788_v57, -inf  ;;  %v571_v63 = vsel %vm555_vm3, %v1410_v59, 0.0 }
 0x1e2   :  { %791 = vmax.xlane.f32.xlu2 %v790_v58 }
 0x1e7   :  { %v785_v60 = vpop.f32.mrf.mxu3 }
 0x1e8   :  { %v789_v61 = vsel %vm1353_vm4, %v785_v60, -1e+30 }
 0x1e9   :  { %v793_v62 = vsel %vm555_vm3, %v789_v61, -inf }
 0x1ea   :  { %794 = vmax.xlane.f32.xlu0 %v793_v62  ;;  %572 = vadd.xlane.f32.xlu2 %v571_v63 }
 0x202   :  { %653 = vrot.lane.b32.xlu2 %v583_v3, %s1072_s4 }
 0x23f   :  { %v712_v1 = vpop.xlane.xlu0 %711 }
 0x240   :  { %v716_v4 = vsub.f32 %v708_v37, %v712_v1 }
 0x242   :  { %v718_v5 = vmul.f32 1.442695, %v716_v4 }
 0x244   :  { %1016 = vpow2.f32 %v718_v5 }
 0x245   :  { %v632_v9 = vpop.xlane.xlu2 %631 }
 0x246   :  { %v636_v10 = vsub.f32 %v628_v43, %v632_v9 }
 0x247   :  { %v715_v12 = vpop.xlane.xlu1 %714 }
 0x248   :  { %v638_v14 = vmul.f32 1.442695, %v636_v10  ;;  %v717_v15 = vsub.f32 %v709_v46, %v715_v12 }
 0x24a   :  { %v1420_v17 = vpop.eup %1016  ;;  %1018 = vpow2.f32 %v638_v14  ;;  %v720_v18 = vmul.f32 1.442695, %v717_v15 }
 0x24b   :  { %v722_v22 = vsel %vm555_vm3, %v1420_v17, 0.0 }
 0x24c   :  { %1020 = vpow2.f32 %v720_v18  ;;  %723 = vadd.xlane.f32.xlu0 %v722_v22  ;;  %v998_v22 = vld [vmem:[%s1475_s13 + $0x8] sm:$0xff]  ;;  %s1076_s13 = smov [#allocation3]  }
 0x24d   :  { %v635_v7 = vpop.xlane.xlu2 %634  ;;  %876 = vmatpush.bf16.msrb.mxu1 %v998_v22  ;;  %s911_s6 = sshll.u32 %s1076_s13, 4  ;;  %s912_s6 = int_to_ptr.vmem [resolvable:$true] %s911_s6 }
 0x24e   :  { %v637_v23 = vsub.f32 %v629_v52, %v635_v7 }
 0x24f   :  { %v570_v33 = vpop.xlane.xlu1 %569 }
 0x250   :  { %v1019_v24 = vpop.eup %1018  ;;  %v640_v25 = vmul.f32 1.442695, %v637_v23 }
 0x251   :  { %v642_v20 = vsel %vm555_vm3, %v1019_v24, 0.0  ;;  %877 = vmatpush.bf16.msrb.mxu1 %v997_v6 }
 0x252   :  { %v1021_v26 = vpop.eup %1020  ;;  %1022 = vpow2.f32 %v640_v25 }
 0x253   :  { %v725_v27 = vsel %vm555_vm3, %v1021_v26, 0.0 }
 0x254   :  { %643 = vadd.xlane.f32.xlu0 %v642_v20  ;;  %726 = vadd.xlane.f32.xlu1 %v725_v27  ;;  %v1011_v20 = vld [vmem:[%s1476_s14] ss:$0 sm:$0xff] }
 0x255   :  { %v792_v29 = vpop.xlane.xlu2 %791 }
 0x256   :  { %v796_v30 = vsub.f32 %v788_v57, %v792_v29 }
 0x258   :  { %v1023_v31 = vpop.eup %1022  ;;  %v798_v32 = vmul.f32 1.442695, %v796_v30 }
 0x259   :  { %v645_v28 = vsel %vm555_vm3, %v1023_v31, 0.0 }
 0x25a   :  { %1024 = vpow2.f32 %v798_v32 }
 0x25b   :  { %1026 = vrcp.f32 %v570_v33 }
 0x25c   :  { %646 = vadd.xlane.f32.xlu1 %v645_v28 }
 0x25d   :  { %v795_v34 = vpop.xlane.xlu0 %794  ;;  %v573_v35 = vpop.xlane.xlu2 %572 }
 0x25e   :  { %v797_v36 = vsub.f32 %v789_v61, %v795_v34  ;;  %1028 = vrcp.f32 %v573_v35 }
 0x260   :  { %v1025_v37 = vpop.eup %1024  ;;  %v800_v39 = vmul.f32 1.442695, %v797_v36 }
 0x261   :  { %v802_v38 = vsel %vm555_vm3, %v1025_v37, 0.0  ;;  %v1027_v40 = vpop.eup %1026 }
 0x262   :  { %1030 = vpow2.f32 %v800_v39  ;;  %803 = vadd.xlane.f32.xlu0 %v802_v38  ;;  %v576_v42 = vmul.f32 %v1027_v40, %v1400_v50 }
 0x264   :  { %v1029_v41 = vpop.eup %1028 }
 0x265   :  { %v577_v43 = vmul.f32 %v1029_v41, %v1410_v59  ;;  %v654_v47 = vpop.permute.xlu2 %653 }
 0x266   :  { %666 = vmatpush.bf16.msra.mxu0 %v654_v47 }
 0x267   :  { %v578_v44 = vpack.c.bf16 %v577_v43, %v576_v42 }
 0x268   :  { %v1031_v45 = vpop.eup %1030 }
 0x269   :  { %971 = vmatmul.msk.bf16.vlgmr.msrb.gmra.mxu2 %vm555_vm3, %v578_v44  ;;  %v805_v46 = vsel %vm555_vm3, %v1031_v45, 0.0 }
 0x26a   :  { %806 = vadd.xlane.f32.xlu1 %v805_v46 }
 0x276   :  { %733 = vrot.lane.b32.xlu0 %v583_v3, %s1070_s8  ;;  %s1074_s8 = smov 16  }
 0x283   :  { %813 = vrot.lane.b32.xlu1 %v583_v3, %s1071_s20  ;;  %s1075_s20 = smov 24  }
 0x2bf   :  { %v724_v48 = vpop.xlane.xlu0 %723 }
 0x2c7   :  { %v727_v49 = vpop.xlane.xlu1 %726  ;;  %v644_v51 = vpop.xlane.xlu0 %643 }
 0x2c8   :  { %1032 = vrcp.f32 %v644_v51 }
 0x2ce   :  { %v1033_v52 = vpop.eup %1032 }
 0x2cf   :  { %v647_v50 = vpop.xlane.xlu1 %646  ;;  %v650_v54 = vmul.f32 %v1033_v52, %v1019_v24 }
 0x2d0   :  { %1034 = vrcp.f32 %v647_v50 }
 0x2d1   :  { %1036 = vrcp.f32 %v727_v49 }
 0x2d2   :  { %1038 = vrcp.f32 %v724_v48 }
 0x2d5   :  { %v804_v57 = vpop.xlane.xlu0 %803 }
 0x2d6   :  { %v1035_v53 = vpop.eup %1034 }
 0x2d7   :  { %v651_v55 = vmul.f32 %v1035_v53, %v1023_v31  ;;  %v1037_v58 = vpop.eup %1036 }
 0x2d8   :  { %v1039_v59 = vpop.eup %1038  ;;  %v731_v60 = vmul.f32 %v1037_v58, %v1021_v26 }
 0x2d9   :  { %v652_v56 = vpack.c.bf16 %v651_v55, %v650_v54  ;;  %v730_v62 = vmul.f32 %v1039_v59, %v1420_v17 }
 0x2db   :  { %973 = vmatmul.msk.bf16.vlgmr.msra.gmra.mxu0 %vm555_vm3, %v652_v56  ;;  %v732_v0 = vpack.c.bf16 %v731_v60, %v730_v62 }
 0x2dd   :  { %v807_v61 = vpop.xlane.xlu1 %806 }
 0x2de   :  { %1040 = vrcp.f32 %v807_v61 }
 0x2df   :  { %1042 = vrcp.f32 %v804_v57 }
 0x2e4   :  { %v1041_v2 = vpop.eup %1040 }
 0x2e5   :  { %v1043_v4 = vpop.eup %1042  ;;  %v811_v5 = vmul.f32 %v1041_v2, %v1031_v45 }
 0x2e6   :  { %v810_v9 = vmul.f32 %v1043_v4, %v1025_v37 }
 0x2e8   :  { %v734_v63 = vpop.permute.xlu0 %733  ;;  %v812_v11 = vpack.c.bf16 %v811_v5, %v810_v9 }
 0x2e9   :  { %746 = vmatpush.bf16.msra.mxu2 %v734_v63 }
 0x2ec   :  { %v597_v1 = vpop.f32.mrf.mxu2  ;;  %975 = vmatmul.msk.bf16.vlgmr.msra.gmra.mxu2 %vm555_vm3, %v732_v0 }
 0x2ed   :  { %602 = vst.msk [vmem:[#allocation2] sm:$0xff] %vm532_vm1, %v597_v1 }
 0x2f4   :  { %v599_v8 = vpop.f32.mrf.mxu2 }
 0x2f5   :  { %603 = vst.msk [vmem:[#allocation2 + $0x8] sm:$0xff] %vm532_vm1, %v599_v8  ;;  %v814_v10 = vpop.permute.xlu1 %813 }
 0x2f6   :  { %826 = vmatpush.bf16.msrb.mxu0 %v814_v10 }
 0x2f9   :  { %977 = vmatmul.msk.bf16.vlgmr.msrb.gmra.mxu0 %vm555_vm3, %v812_v11 }
 0x358   :  { %v668_v12 = vpop.f32.mrf.mxu0 }
 0x359   :  { %675 = vrot.lane.b32.xlu2 %v668_v12, %s1073_s12 }
 0x360   :  { %v670_v13 = vpop.f32.mrf.mxu0 }
 0x361   :  { %677 = vrot.lane.b32.xlu2 %v670_v13, %s1073_s12 }
 0x36f   :  { %v748_v14 = vpop.f32.mrf.mxu2 }
 0x370   :  { %755 = vrot.lane.b32.xlu0 %v748_v14, %s1074_s8 }
 0x376   :  { %v828_v15 = vpop.f32.mrf.mxu0 }
 0x377   :  { %v750_v16 = vpop.f32.mrf.mxu2  ;;  %835 = vrot.lane.b32.xlu1 %v828_v15, %s1075_s20 }
 0x378   :  { %757 = vrot.lane.b32.xlu2 %v750_v16, %s1074_s8 }
 0x37e   :  { %v830_v17 = vpop.f32.mrf.mxu0 }
 0x37f   :  { %837 = vrot.lane.b32.xlu0 %v830_v17, %s1075_s20 }
 0x3b3   :  { %v676_v18 = vpop.permute.xlu2 %675 }
 0x3b4   :  { %682 = vst.msk [vmem:[#allocation2] sm:$0xff] %vm681_vm5, %v676_v18 }
 0x3bb   :  { %v678_v19 = vpop.permute.xlu2 %677 }
 0x3bc   :  { %683 = vst.msk [vmem:[#allocation2 + $0x8] sm:$0xff] %vm681_vm5, %v678_v19 }
 0x3d2   :  { %v758_v21 = vpop.permute.xlu2 %757 }
 0x3d3   :  { %763 = vst.msk [vmem:[#allocation2 + $0x8] sm:$0xff] %vm761_vm6, %v758_v21 }
 0x3e2   :  { %v756_v7 = vpop.permute.xlu0 %755 }
 0x3e3   :  { %762 = vst.msk [vmem:[#allocation2] sm:$0xff] %vm761_vm6, %v756_v7 }
 0x3e9   :  { %v836_v23 = vpop.permute.xlu1 %835 }
 0x3ea   :  { %842 = vst.msk [vmem:[#allocation2] sm:$0xff] %vm841_vm7, %v836_v23 }
 0x3f1   :  { %v838_v3 = vpop.permute.xlu0 %837  ;;  %v844_v24 = vld [vmem:[#allocation2] sm:$0xff] }
 0x3f2   :  { %843 = vst.msk [vmem:[#allocation2 + $0x8] sm:$0xff] %vm841_vm7, %v838_v3 }
 0x3f9   :  { %v845_v25 = vld [vmem:[#allocation2 + $0x8] sm:$0xff] }
 0x3fa   :  { %v846_v26 = vpack.c.bf16 %v845_v25, %v844_v24 }
 0x3fc   :  { %986 = vmatmul.msk.bf16.vlgmr.msrb.gmra.mxu1 %vm288_vm0, %v846_v26 }
 0x479   :  { %v879_v27 = vpop.f32.mrf.mxu1 }
 0x47a   :  { %v880_v29 = vadd.f32 %v1011_v20, %v879_v27 }
 0x47c   :  { %v886_v30 = vrot.slane %v880_v29, 2  ;;  %v887_v31 = vrot.slane %v880_v29, 4  ;;  %v888_v32 = vrot.slane %v880_v29, 6  ;;  %899 = vst.msk [vmem:[#allocation3] sm:$0x3] %vm898_vm8, %v880_v29 }
 0x47e   :  { %900 = vst.msk [vmem:[#allocation3 + $0x2] sm:$0x3] %vm898_vm8, %v886_v30 }
 0x47f   :  { %901 = vst.msk [vmem:[#allocation3 + $0x4] sm:$0x3] %vm898_vm8, %v887_v31 }
 0x480   :  { %902 = vst.msk [vmem:[#allocation3 + $0x6] sm:$0x3] %vm898_vm8, %v888_v32 }
 0x481   :  { %v881_v33 = vpop.f32.mrf.mxu1 }
 0x482   :  { %v882_v28 = vadd.f32 %v1011_v20, %v881_v33 }
 0x484   :  { %v889_v34 = vrot.slane %v882_v28, 2  ;;  %v890_v35 = vrot.slane %v882_v28, 4  ;;  %v891_v36 = vrot.slane %v882_v28, 6  ;;  %903 = vst.msk [vmem:[#allocation3 + $0x8] sm:$0x3] %vm898_vm8, %v882_v28 }
 0x486   :  { %904 = vst.msk [vmem:[#allocation3 + $0xa] sm:$0x3] %vm898_vm8, %v889_v34 }
 0x487   :  { %905 = vst.msk [vmem:[#allocation3 + $0xc] sm:$0x3] %vm898_vm8, %v890_v35 }
 0x488   :  { %906 = vst.msk [vmem:[#allocation3 + $0xe] sm:$0x3] %vm898_vm8, %v891_v36 }
 0x489   :  { %919 = dma.vmem_to_hbm [thread:$0]  %s912_s6, 256, %s914_s23, [#allocation4], %s1077_s24, %s1077_s24, %s1078_s25  }
 0x48a   :  { %1068 = dma.done.wait [#allocation4], 256  }
 0x48b   :  { %1069 = vsyncadd [#allocation4], 4294967040 }
 0x48c   :  { %924 = vsyncpa [#allocation4], 1 }

</bundles_post_ra>
